<compile_context>
chip_gen: v7x
topology: tpu7x:2x2x1
jax: 0.10.0
libtpu: 0.0.40
codegen_flags: <defaults>
</compile_context>

<pallas_src>
import functools

import jax
import jax.numpy as jnp
from jax.experimental import pallas as pl
from jax.experimental.pallas import tpu as pltpu


# ----------------------------- in-kernel helpers -----------------------------

def _layer_norm(x, gamma, beta, eps):
    mu = jnp.mean(x, axis=-1, keepdims=True)
    xc = x - mu
    var = jnp.mean(xc * xc, axis=-1, keepdims=True)
    return xc * jax.lax.rsqrt(var + eps) * gamma + beta


def _erf(x):
    # Abramowitz & Stegun 7.1.26 rational approximation, |err| < 1.5e-7.
    # Uses exp / mul / add / where + an EUP approximate reciprocal.
    a1, a2, a3, a4, a5 = (0.254829592, -0.284496736, 1.421413741,
                          -1.453152027, 1.061405429)
    p = 0.3275911
    ax = jnp.abs(x)
    t = pl.reciprocal(1.0 + p * ax, approx=True)          # EUP, not a VALU divide
    poly = ((((a5 * t + a4) * t + a3) * t + a2) * t + a1) * t
    y = 1.0 - poly * jnp.exp(-ax * ax)
    return jnp.where(x >= 0.0, y, -y)


def _gelu_exact(x):
    # PyTorch nn.GELU() default = exact (erf-based) GELU.
    return 0.5 * x * (1.0 + _erf(x * 0.7071067811865476))


# --------------------------------- kernel ------------------------------------

def _block_kernel(x_ref,
                  ln1g_ref, ln1b_ref,
                  wqkv_ref, bqkv_ref,
                  wproj_ref, bproj_ref,
                  ln2g_ref, ln2b_ref,
                  w1_ref, b1_ref,
                  w2_ref, b2_ref,
                  o_ref,
                  ocat_ref,                     # (N, C) f32 head-concat scratch
                  *, num_heads, head_dim, eps):
    x = x_ref[0].astype(jnp.float32)            # (N, C) for this batch element
    C = num_heads * head_dim

    # ---- LN1 -> fused QKV projection: one full-width bf16 MXU matmul ----
    h = _layer_norm(x, ln1g_ref[...], ln1b_ref[...], eps).astype(jnp.bfloat16)
    qkv = jnp.dot(h, wqkv_ref[...],
                  preferred_element_type=jnp.float32) + bqkv_ref[...]   # (N, 3C) f32
    # The attention scale is already folded into the Q columns of wqkv/bqkv.

    # ---- multi-head attention ----
    # Each head writes its output into a (static) lane slice of the concat
    # scratch so the output projection below runs as a single full-C matmul.
    for hd in range(num_heads):
        lo = hd * head_dim
        qh = qkv[:, lo:lo + head_dim].astype(jnp.bfloat16)               # (N, D)
        kh = qkv[:, C + lo:C + lo + head_dim].astype(jnp.bfloat16)       # (N, D)
        vh = qkv[:, 2 * C + lo:2 * C + lo + head_dim].astype(jnp.bfloat16)
        s = jax.lax.dot_general(qh, kh, (((1,), (1,)), ((), ())),
                                preferred_element_type=jnp.float32)      # (N, N)
        s = s - jnp.max(s, axis=-1, keepdims=True)
        p = jnp.exp(s)
        p = p * pl.reciprocal(jnp.sum(p, axis=-1, keepdims=True), approx=True)
        oh = jnp.dot(p.astype(jnp.bfloat16), vh,
                     preferred_element_type=jnp.float32)                 # (N, D)
        ocat_ref[:, lo:lo + head_dim] = oh

    # Single full-width output projection (K = C contraction on the MXU).
    attn = jnp.dot(ocat_ref[...].astype(jnp.bfloat16), wproj_ref[...],
                   preferred_element_type=jnp.float32) + bproj_ref[...]
    x1 = x + attn                                                        # residual 1

    # ---- LN2 -> MLP (fc1 -> exact GELU -> fc2), biases fused ----
    h2 = _layer_norm(x1, ln2g_ref[...], ln2b_ref[...], eps).astype(jnp.bfloat16)
    hmid = jnp.dot(h2, w1_ref[...],
                   preferred_element_type=jnp.float32) + b1_ref[...]
    hmid = _gelu_exact(hmid).astype(jnp.bfloat16)
    mlp = jnp.dot(hmid, w2_ref[...],
                  preferred_element_type=jnp.float32) + b2_ref[...]

    o_ref[0] = (x1 + mlp).astype(o_ref.dtype)                            # residual 2


# -------------------------------- wrapper ------------------------------------

def _prep_params(params, *, num_heads):
    """Cast matmul weights to bf16 and fold the attention scale into Q.

    In production these transformed params would be stored once instead of
    being re-derived per call.
    """
    C = params["wproj"].shape[0]
    head_dim = C // num_heads
    scale = head_dim ** -0.5
    col_scale = jnp.concatenate(
        [jnp.full((C,), scale, jnp.float32), jnp.ones((2 * C,), jnp.float32)])
    return dict(
        ln1_g=params["ln1_g"].astype(jnp.float32),
        ln1_b=params["ln1_b"].astype(jnp.float32),
        wqkv=(params["wqkv"] * col_scale[None, :]).astype(jnp.bfloat16),
        bqkv=(params["bqkv"] * col_scale[None, :]).astype(jnp.float32),
        wproj=params["wproj"].astype(jnp.bfloat16),
        bproj=params["bproj"].astype(jnp.float32),
        ln2_g=params["ln2_g"].astype(jnp.float32),
        ln2_b=params["ln2_b"].astype(jnp.float32),
        w1=params["w1"].astype(jnp.bfloat16),
        b1=params["b1"].astype(jnp.float32),
        w2=params["w2"].astype(jnp.bfloat16),
        b2=params["b2"].astype(jnp.float32),
    )


def _vmem_limit_bytes(N, C, hidden, x_itemsize):
    """Explicit scoped-VMEM budget: weights (x2 buffers) + I/O tiles + scratch
    + rough transient estimate, with headroom; clamped to a physically safe
    ceiling on all TPU generations."""
    weights_bf16 = 2 * (3 * C * C + C * C + C * hidden + hidden * C)
    small_f32 = 4 * (3 * C + 6 * C + hidden)
    io_tiles = 2 * 2 * N * C * x_itemsize            # x + out, double-buffered
    scratch = 4 * N * C                               # head-concat scratch (f32)
    transients = 4 * (3 * N * C + N * hidden + 2 * N * N + 6 * N * C)
    est = 2 * (weights_bf16 + small_f32) + io_tiles + scratch + transients
    est = int(est * 1.5)
    return max(16 * 2 ** 20, min(64 * 2 ** 20, est))


def block_forward(x, params, *, num_heads, eps=1e-6, interpret=False):
    """Forward pass of `Block` (inference: dropout / drop_path = identity).

    x: (B, N, C) channel-last.  Weights are in (in_features, out_features)
    layout, i.e. the transpose of torch.nn.Linear.weight; 1-D params are
    (1, dim)-shaped.
    """
    B, N, C = x.shape
    assert C % num_heads == 0
    head_dim = C // num_heads
    hidden = params["w1"].shape[1]
    p = _prep_params(params, num_heads=num_heads)

    kernel = functools.partial(_block_kernel, num_heads=num_heads,
                               head_dim=head_dim, eps=eps)

    x_spec = pl.BlockSpec((1, N, C), lambda b: (b, 0, 0))

    def resident(shape):
        # Whole array in one block, constant index_map -> DMA'd once,
        # stays resident in VMEM for every grid step.
        return pl.BlockSpec(shape, lambda b: (0,) * len(shape))

    in_specs = [
        x_spec,
        resident((1, C)), resident((1, C)),            # ln1 gamma, beta
        resident((C, 3 * C)), resident((1, 3 * C)),    # wqkv, bqkv (scale folded)
        resident((C, C)), resident((1, C)),            # wproj, bproj
        resident((1, C)), resident((1, C)),            # ln2 gamma, beta
        resident((C, hidden)), resident((1, hidden)),  # w1, b1
        resident((hidden, C)), resident((1, C)),       # w2, b2
    ]

    return pl.pallas_call(
        kernel,
        out_shape=jax.ShapeDtypeStruct((B, N, C), x.dtype),
        grid=(B,),
        in_specs=in_specs,
        out_specs=x_spec,
        scratch_shapes=[pltpu.VMEM((N, C), jnp.float32)],
        compiler_params=pltpu.CompilerParams(
            dimension_semantics=("parallel",),
            vmem_limit_bytes=_vmem_limit_bytes(N, C, hidden, x.dtype.itemsize)),
        interpret=interpret,
    )(x,
      p["ln1_g"], p["ln1_b"],
      p["wqkv"], p["bqkv"],
      p["wproj"], p["bproj"],
      p["ln2_g"], p["ln2_b"],
      p["w1"], p["b1"],
      p["w2"], p["b2"])


# --------------------------- pure-JAX reference -------------------------------

def block_reference(x, p, *, num_heads, eps=1e-6):
    B, N, C = x.shape
    hd = C // num_heads

    def ln(y, g, b):
        mu = jnp.mean(y, -1, keepdims=True)
        var = jnp.mean((y - mu) ** 2, -1, keepdims=True)
        return (y - mu) / jnp.sqrt(var + eps) * g + b

    h = ln(x, p["ln1_g"], p["ln1_b"])
    qkv = h @ p["wqkv"] + p["bqkv"]                                  # (B,N,3C)
    qkv = qkv.reshape(B, N, 3, num_heads, hd).transpose(2, 0, 3, 1, 4)
    q, k, v = qkv[0], qkv[1], qkv[2]                                 # (B,H,N,hd)
    attn = (q @ jnp.swapaxes(k, -2, -1)) * (hd ** -0.5)
    attn = jax.nn.softmax(attn, axis=-1)
    o = (attn @ v).transpose(0, 2, 1, 3).reshape(B, N, C)
    x = x + (o @ p["wproj"] + p["bproj"])
    h2 = ln(x, p["ln2_g"], p["ln2_b"])
    m = jax.nn.gelu(h2 @ p["w1"] + p["b1"], approximate=False)
    return x + (m @ p["w2"] + p["b2"])


# ---------------------------------- main --------------------------------------

if __name__ == "__main__":
    B, N, dim, num_heads, mlp_ratio = 2, 8, 32, 4, 4.0
    hidden = int(dim * mlp_ratio)

    key = jax.random.PRNGKey(0)
    ks = jax.random.split(key, 12)

    def rnd(k, shape, scale=0.1):
        return (scale * jax.random.normal(k, shape)).astype(jnp.float32)

    params = dict(
        ln1_g=(1.0 + rnd(ks[0], (1, dim))).astype(jnp.float32),
        ln1_b=rnd(ks[1], (1, dim), 0.05),
        wqkv=rnd(ks[2], (dim, 3 * dim)),
        bqkv=jnp.zeros((1, 3 * dim), jnp.float32),   # qkv_bias=False (default)
        wproj=rnd(ks[3], (dim, dim)),
        bproj=rnd(ks[4], (1, dim), 0.02),
        ln2_g=(1.0 + rnd(ks[5], (1, dim))).astype(jnp.float32),
        ln2_b=rnd(ks[6], (1, dim), 0.05),
        w1=rnd(ks[7], (dim, hidden)),
        b1=rnd(ks[8], (1, hidden), 0.02),
        w2=rnd(ks[9], (hidden, dim)),
        b2=rnd(ks[10], (1, dim), 0.02),
    )
    x = jax.random.normal(ks[11], (B, N, dim), jnp.float32)

    out = block_forward(x, params, num_heads=num_heads)
    out = jax.block_until_ready(out)

    ref = block_reference(x, params, num_heads=num_heads)
    assert out.shape == (B, N, dim)
    if not bool(jnp.allclose(out, ref, atol=2e-2, rtol=2e-2)):
        max_err = float(jnp.max(jnp.abs(out - ref)))
        raise AssertionError(f"kernel/reference mismatch, max abs err={max_err}")

    print("KERNEL_OK")
</pallas_src>

<mosaic_0001>
module attributes {stable_mosaic.version = 11 : i64} {
  func.func @_block_kernel(%arg0: i32, %arg1: memref<1x8x32xf32, #tpu.memory_space<vmem>>, %arg2: memref<1x32xf32, #tpu.memory_space<vmem>>, %arg3: memref<1x32xf32, #tpu.memory_space<vmem>>, %arg4: memref<32x96xbf16, #tpu.memory_space<vmem>>, %arg5: memref<1x96xf32, #tpu.memory_space<vmem>>, %arg6: memref<32x32xbf16, #tpu.memory_space<vmem>>, %arg7: memref<1x32xf32, #tpu.memory_space<vmem>>, %arg8: memref<1x32xf32, #tpu.memory_space<vmem>>, %arg9: memref<1x32xf32, #tpu.memory_space<vmem>>, %arg10: memref<32x128xbf16, #tpu.memory_space<vmem>>, %arg11: memref<1x128xf32, #tpu.memory_space<vmem>>, %arg12: memref<128x32xbf16, #tpu.memory_space<vmem>>, %arg13: memref<1x32xf32, #tpu.memory_space<vmem>>, %arg14: memref<1x8x32xf32, #tpu.memory_space<vmem>>, %arg15: memref<8x32xf32, #tpu.memory_space<vmem>>) attributes {dimension_semantics = [#tpu.dimension_semantics<parallel>], iteration_bounds = array<i64: 2>, scalar_prefetch = 0 : i64, scratch_operands = 1 : i64, tpu.core_type = #tpu.core_type<tc>, window_params = [{transform_indices = @transform_0, window_bounds = array<i64: 1, 8, 32>}, {pipeline_mode = #tpu.pipeline_mode<synchronous>, transform_indices = @transform_1, window_bounds = array<i64: 1, 32>}, {pipeline_mode = #tpu.pipeline_mode<synchronous>, transform_indices = @transform_2, window_bounds = array<i64: 1, 32>}, {pipeline_mode = #tpu.pipeline_mode<synchronous>, transform_indices = @transform_3, window_bounds = array<i64: 32, 96>}, {pipeline_mode = #tpu.pipeline_mode<synchronous>, transform_indices = @transform_4, window_bounds = array<i64: 1, 96>}, {pipeline_mode = #tpu.pipeline_mode<synchronous>, transform_indices = @transform_5, window_bounds = array<i64: 32, 32>}, {pipeline_mode = #tpu.pipeline_mode<synchronous>, transform_indices = @transform_6, window_bounds = array<i64: 1, 32>}, {pipeline_mode = #tpu.pipeline_mode<synchronous>, transform_indices = @transform_7, window_bounds = array<i64: 1, 32>}, {pipeline_mode = #tpu.pipeline_mode<synchronous>, transform_indices = @transform_8, window_bounds = array<i64: 1, 32>}, {pipeline_mode = #tpu.pipeline_mode<synchronous>, transform_indices = @transform_9, window_bounds = array<i64: 32, 128>}, {pipeline_mode = #tpu.pipeline_mode<synchronous>, transform_indices = @transform_10, window_bounds = array<i64: 1, 128>}, {pipeline_mode = #tpu.pipeline_mode<synchronous>, transform_indices = @transform_11, window_bounds = array<i64: 128, 32>}, {pipeline_mode = #tpu.pipeline_mode<synchronous>, transform_indices = @transform_12, window_bounds = array<i64: 1, 32>}, {transform_indices = @transform_13, window_bounds = array<i64: 1, 8, 32>}]} {
    %c0 = arith.constant 0 : index
    %c0_0 = arith.constant 0 : index
    %c0_1 = arith.constant 0 : index
    %0 = vector.load %arg1[%c0, %c0_0, %c0_1] : memref<1x8x32xf32, #tpu.memory_space<vmem>>, vector<1x8x32xf32>
    %1 = vector.shape_cast %0 : vector<1x8x32xf32> to vector<8x32xf32>
    %c0_2 = arith.constant 0 : index
    %c0_3 = arith.constant 0 : index
    %2 = vector.load %arg2[%c0_2, %c0_3] : memref<1x32xf32, #tpu.memory_space<vmem>>, vector<1x32xf32>
    %c0_4 = arith.constant 0 : index
    %c0_5 = arith.constant 0 : index
    %3 = vector.load %arg3[%c0_4, %c0_5] : memref<1x32xf32, #tpu.memory_space<vmem>>, vector<1x32xf32>
    %cst = arith.constant dense<0.000000e+00> : vector<8xf32>
    %4 = vector.multi_reduction <add>, %1, %cst [1] : vector<8x32xf32> to vector<8xf32>
    %5 = vector.shape_cast %4 : vector<8xf32> to vector<8x1xf32>
    %cst_6 = arith.constant 3.200000e+01 : f32
    %6 = vector.broadcast %cst_6 : f32 to vector<8x1xf32>
    %7 = arith.divf %5, %6 : vector<8x1xf32>
    %8 = vector.broadcast %7 : vector<8x1xf32> to vector<8x32xf32>
    %9 = arith.subf %1, %8 : vector<8x32xf32>
    %10 = arith.mulf %9, %9 : vector<8x32xf32>
    %cst_7 = arith.constant dense<0.000000e+00> : vector<8xf32>
    %11 = vector.multi_reduction <add>, %10, %cst_7 [1] : vector<8x32xf32> to vector<8xf32>
    %12 = vector.shape_cast %11 : vector<8xf32> to vector<8x1xf32>
    %cst_8 = arith.constant 3.200000e+01 : f32
    %13 = vector.broadcast %cst_8 : f32 to vector<8x1xf32>
    %14 = arith.divf %12, %13 : vector<8x1xf32>
    %cst_9 = arith.constant 9.99999997E-7 : f32
    %15 = vector.broadcast %cst_9 : f32 to vector<8x1xf32>
    %16 = arith.addf %14, %15 : vector<8x1xf32>
    %17 = math.rsqrt %16 : vector<8x1xf32>
    %18 = vector.broadcast %17 : vector<8x1xf32> to vector<8x32xf32>
    %19 = arith.mulf %9, %18 : vector<8x32xf32>
    %20 = vector.broadcast %2 : vector<1x32xf32> to vector<8x32xf32>
    %21 = arith.mulf %19, %20 : vector<8x32xf32>
    %22 = vector.broadcast %3 : vector<1x32xf32> to vector<8x32xf32>
    %23 = arith.addf %21, %22 : vector<8x32xf32>
    %24 = arith.truncf %23 : vector<8x32xf32> to vector<8x32xbf16>
    %c0_10 = arith.constant 0 : index
    %c0_11 = arith.constant 0 : index
    %25 = vector.load %arg4[%c0_10, %c0_11] : memref<32x96xbf16, #tpu.memory_space<vmem>>, vector<32x96xbf16>
    %cst_12 = arith.constant dense<0.000000e+00> : vector<8x96xf32>
    %26 = tpu.matmul %24, %25, %cst_12 {dimension_numbers = #tpu.dot_dimension_numbers<[1], [0], [0], [1], [0, 0, 1, 1], [], []>} : vector<8x32xbf16>, vector<32x96xbf16>, vector<8x96xf32> -> vector<8x96xf32>
    %c0_13 = arith.constant 0 : index
    %c0_14 = arith.constant 0 : index
    %27 = vector.load %arg5[%c0_13, %c0_14] : memref<1x96xf32, #tpu.memory_space<vmem>>, vector<1x96xf32>
    %28 = vector.broadcast %27 : vector<1x96xf32> to vector<8x96xf32>
    %29 = arith.addf %26, %28 : vector<8x96xf32>
    %30 = vector.extract_strided_slice %29 {offsets = [0, 0], sizes = [8, 8], strides = [1, 1]} : vector<8x96xf32> to vector<8x8xf32>
    %31 = arith.truncf %30 : vector<8x8xf32> to vector<8x8xbf16>
    %32 = vector.extract_strided_slice %29 {offsets = [0, 32], sizes = [8, 8], strides = [1, 1]} : vector<8x96xf32> to vector<8x8xf32>
    %33 = arith.truncf %32 : vector<8x8xf32> to vector<8x8xbf16>
    %34 = vector.extract_strided_slice %29 {offsets = [0, 64], sizes = [8, 8], strides = [1, 1]} : vector<8x96xf32> to vector<8x8xf32>
    %35 = arith.truncf %34 : vector<8x8xf32> to vector<8x8xbf16>
    %cst_15 = arith.constant dense<0.000000e+00> : vector<8x8xf32>
    %36 = tpu.matmul %31, %33, %cst_15 {dimension_numbers = #tpu.dot_dimension_numbers<[1], [1], [0], [0], [0, 0, 1, 0], [], []>} : vector<8x8xbf16>, vector<8x8xbf16>, vector<8x8xf32> -> vector<8x8xf32>
    %cst_16 = arith.constant dense<0xFF800000> : vector<8xf32>
    %37 = vector.multi_reduction <maximumf>, %36, %cst_16 [1] : vector<8x8xf32> to vector<8xf32>
    %38 = vector.shape_cast %37 : vector<8xf32> to vector<8x1xf32>
    %39 = vector.broadcast %38 : vector<8x1xf32> to vector<8x8xf32>
    %40 = arith.subf %36, %39 : vector<8x8xf32>
    %41 = math.exp %40 : vector<8x8xf32>
    %cst_17 = arith.constant dense<0.000000e+00> : vector<8xf32>
    %42 = vector.multi_reduction <add>, %41, %cst_17 [1] : vector<8x8xf32> to vector<8xf32>
    %43 = vector.shape_cast %42 : vector<8xf32> to vector<8x1xf32>
    %44 = tpu.reciprocal %43 {approx = true} : vector<8x1xf32> -> vector<8x1xf32>
    %45 = vector.broadcast %44 : vector<8x1xf32> to vector<8x8xf32>
    %46 = arith.mulf %41, %45 : vector<8x8xf32>
    %47 = arith.truncf %46 : vector<8x8xf32> to vector<8x8xbf16>
    %cst_18 = arith.constant dense<0.000000e+00> : vector<8x8xf32>
    %48 = tpu.matmul %47, %35, %cst_18 {dimension_numbers = #tpu.dot_dimension_numbers<[1], [0], [0], [1], [0, 0, 1, 1], [], []>} : vector<8x8xbf16>, vector<8x8xbf16>, vector<8x8xf32> -> vector<8x8xf32>
    %c0_19 = arith.constant 0 : index
    %c0_20 = arith.constant 0 : index
    %49 = vector.load %arg15[%c0_19, %c0_20] : memref<8x32xf32, #tpu.memory_space<vmem>>, vector<8x8xf32>
    tpu.vector_store %arg15[%c0_19, %c0_20], %48 {strides = array<i32>} : memref<8x32xf32, #tpu.memory_space<vmem>>, vector<8x8xf32>,
    %50 = vector.extract_strided_slice %29 {offsets = [0, 8], sizes = [8, 8], strides = [1, 1]} : vector<8x96xf32> to vector<8x8xf32>
    %51 = arith.truncf %50 : vector<8x8xf32> to vector<8x8xbf16>
    %52 = vector.extract_strided_slice %29 {offsets = [0, 40], sizes = [8, 8], strides = [1, 1]} : vector<8x96xf32> to vector<8x8xf32>
    %53 = arith.truncf %52 : vector<8x8xf32> to vector<8x8xbf16>
    %54 = vector.extract_strided_slice %29 {offsets = [0, 72], sizes = [8, 8], strides = [1, 1]} : vector<8x96xf32> to vector<8x8xf32>
    %55 = arith.truncf %54 : vector<8x8xf32> to vector<8x8xbf16>
    %cst_21 = arith.constant dense<0.000000e+00> : vector<8x8xf32>
    %56 = tpu.matmul %51, %53, %cst_21 {dimension_numbers = #tpu.dot_dimension_numbers<[1], [1], [0], [0], [0, 0, 1, 0], [], []>} : vector<8x8xbf16>, vector<8x8xbf16>, vector<8x8xf32> -> vector<8x8xf32>
    %cst_22 = arith.constant dense<0xFF800000> : vector<8xf32>
    %57 = vector.multi_reduction <maximumf>, %56, %cst_22 [1] : vector<8x8xf32> to vector<8xf32>
    %58 = vector.shape_cast %57 : vector<8xf32> to vector<8x1xf32>
    %59 = vector.broadcast %58 : vector<8x1xf32> to vector<8x8xf32>
    %60 = arith.subf %56, %59 : vector<8x8xf32>
    %61 = math.exp %60 : vector<8x8xf32>
    %cst_23 = arith.constant dense<0.000000e+00> : vector<8xf32>
    %62 = vector.multi_reduction <add>, %61, %cst_23 [1] : vector<8x8xf32> to vector<8xf32>
    %63 = vector.shape_cast %62 : vector<8xf32> to vector<8x1xf32>
    %64 = tpu.reciprocal %63 {approx = true} : vector<8x1xf32> -> vector<8x1xf32>
    %65 = vector.broadcast %64 : vector<8x1xf32> to vector<8x8xf32>
    %66 = arith.mulf %61, %65 : vector<8x8xf32>
    %67 = arith.truncf %66 : vector<8x8xf32> to vector<8x8xbf16>
    %cst_24 = arith.constant dense<0.000000e+00> : vector<8x8xf32>
    %68 = tpu.matmul %67, %55, %cst_24 {dimension_numbers = #tpu.dot_dimension_numbers<[1], [0], [0], [1], [0, 0, 1, 1], [], []>} : vector<8x8xbf16>, vector<8x8xbf16>, vector<8x8xf32> -> vector<8x8xf32>
    %c0_25 = arith.constant 0 : index
    %c8 = arith.constant 8 : index
    %69 = vector.load %arg15[%c0_25, %c8] : memref<8x32xf32, #tpu.memory_space<vmem>>, vector<8x8xf32>
    tpu.vector_store %arg15[%c0_25, %c8], %68 {strides = array<i32>} : memref<8x32xf32, #tpu.memory_space<vmem>>, vector<8x8xf32>,
    %70 = vector.extract_strided_slice %29 {offsets = [0, 16], sizes = [8, 8], strides = [1, 1]} : vector<8x96xf32> to vector<8x8xf32>
    %71 = arith.truncf %70 : vector<8x8xf32> to vector<8x8xbf16>
    %72 = vector.extract_strided_slice %29 {offsets = [0, 48], sizes = [8, 8], strides = [1, 1]} : vector<8x96xf32> to vector<8x8xf32>
    %73 = arith.truncf %72 : vector<8x8xf32> to vector<8x8xbf16>
    %74 = vector.extract_strided_slice %29 {offsets = [0, 80], sizes = [8, 8], strides = [1, 1]} : vector<8x96xf32> to vector<8x8xf32>
    %75 = arith.truncf %74 : vector<8x8xf32> to vector<8x8xbf16>
    %cst_26 = arith.constant dense<0.000000e+00> : vector<8x8xf32>
    %76 = tpu.matmul %71, %73, %cst_26 {dimension_numbers = #tpu.dot_dimension_numbers<[1], [1], [0], [0], [0, 0, 1, 0], [], []>} : vector<8x8xbf16>, vector<8x8xbf16>, vector<8x8xf32> -> vector<8x8xf32>
    %cst_27 = arith.constant dense<0xFF800000> : vector<8xf32>
    %77 = vector.multi_reduction <maximumf>, %76, %cst_27 [1] : vector<8x8xf32> to vector<8xf32>
    %78 = vector.shape_cast %77 : vector<8xf32> to vector<8x1xf32>
    %79 = vector.broadcast %78 : vector<8x1xf32> to vector<8x8xf32>
    %80 = arith.subf %76, %79 : vector<8x8xf32>
    %81 = math.exp %80 : vector<8x8xf32>
    %cst_28 = arith.constant dense<0.000000e+00> : vector<8xf32>
    %82 = vector.multi_reduction <add>, %81, %cst_28 [1] : vector<8x8xf32> to vector<8xf32>
    %83 = vector.shape_cast %82 : vector<8xf32> to vector<8x1xf32>
    %84 = tpu.reciprocal %83 {approx = true} : vector<8x1xf32> -> vector<8x1xf32>
    %85 = vector.broadcast %84 : vector<8x1xf32> to vector<8x8xf32>
    %86 = arith.mulf %81, %85 : vector<8x8xf32>
    %87 = arith.truncf %86 : vector<8x8xf32> to vector<8x8xbf16>
    %cst_29 = arith.constant dense<0.000000e+00> : vector<8x8xf32>
    %88 = tpu.matmul %87, %75, %cst_29 {dimension_numbers = #tpu.dot_dimension_numbers<[1], [0], [0], [1], [0, 0, 1, 1], [], []>} : vector<8x8xbf16>, vector<8x8xbf16>, vector<8x8xf32> -> vector<8x8xf32>
    %c0_30 = arith.constant 0 : index
    %c16 = arith.constant 16 : index
    %89 = vector.load %arg15[%c0_30, %c16] : memref<8x32xf32, #tpu.memory_space<vmem>>, vector<8x8xf32>
    tpu.vector_store %arg15[%c0_30, %c16], %88 {strides = array<i32>} : memref<8x32xf32, #tpu.memory_space<vmem>>, vector<8x8xf32>,
    %90 = vector.extract_strided_slice %29 {offsets = [0, 24], sizes = [8, 8], strides = [1, 1]} : vector<8x96xf32> to vector<8x8xf32>
    %91 = arith.truncf %90 : vector<8x8xf32> to vector<8x8xbf16>
    %92 = vector.extract_strided_slice %29 {offsets = [0, 56], sizes = [8, 8], strides = [1, 1]} : vector<8x96xf32> to vector<8x8xf32>
    %93 = arith.truncf %92 : vector<8x8xf32> to vector<8x8xbf16>
    %94 = vector.extract_strided_slice %29 {offsets = [0, 88], sizes = [8, 8], strides = [1, 1]} : vector<8x96xf32> to vector<8x8xf32>
    %95 = arith.truncf %94 : vector<8x8xf32> to vector<8x8xbf16>
    %cst_31 = arith.constant dense<0.000000e+00> : vector<8x8xf32>
    %96 = tpu.matmul %91, %93, %cst_31 {dimension_numbers = #tpu.dot_dimension_numbers<[1], [1], [0], [0], [0, 0, 1, 0], [], []>} : vector<8x8xbf16>, vector<8x8xbf16>, vector<8x8xf32> -> vector<8x8xf32>
    %cst_32 = arith.constant dense<0xFF800000> : vector<8xf32>
    %97 = vector.multi_reduction <maximumf>, %96, %cst_32 [1] : vector<8x8xf32> to vector<8xf32>
    %98 = vector.shape_cast %97 : vector<8xf32> to vector<8x1xf32>
    %99 = vector.broadcast %98 : vector<8x1xf32> to vector<8x8xf32>
    %100 = arith.subf %96, %99 : vector<8x8xf32>
    %101 = math.exp %100 : vector<8x8xf32>
    %cst_33 = arith.constant dense<0.000000e+00> : vector<8xf32>
    %102 = vector.multi_reduction <add>, %101, %cst_33 [1] : vector<8x8xf32> to vector<8xf32>
    %103 = vector.shape_cast %102 : vector<8xf32> to vector<8x1xf32>
    %104 = tpu.reciprocal %103 {approx = true} : vector<8x1xf32> -> vector<8x1xf32>
    %105 = vector.broadcast %104 : vector<8x1xf32> to vector<8x8xf32>
    %106 = arith.mulf %101, %105 : vector<8x8xf32>
    %107 = arith.truncf %106 : vector<8x8xf32> to vector<8x8xbf16>
    %cst_34 = arith.constant dense<0.000000e+00> : vector<8x8xf32>
    %108 = tpu.matmul %107, %95, %cst_34 {dimension_numbers = #tpu.dot_dimension_numbers<[1], [0], [0], [1], [0, 0, 1, 1], [], []>} : vector<8x8xbf16>, vector<8x8xbf16>, vector<8x8xf32> -> vector<8x8xf32>
    %c0_35 = arith.constant 0 : index
    %c24 = arith.constant 24 : index
    %109 = vector.load %arg15[%c0_35, %c24] : memref<8x32xf32, #tpu.memory_space<vmem>>, vector<8x8xf32>
    tpu.vector_store %arg15[%c0_35, %c24], %108 {strides = array<i32>} : memref<8x32xf32, #tpu.memory_space<vmem>>, vector<8x8xf32>,
    %c0_36 = arith.constant 0 : index
    %c0_37 = arith.constant 0 : index
    %110 = vector.load %arg15[%c0_36, %c0_37] : memref<8x32xf32, #tpu.memory_space<vmem>>, vector<8x32xf32>
    %111 = arith.truncf %110 : vector<8x32xf32> to vector<8x32xbf16>
    %c0_38 = arith.constant 0 : index
    %c0_39 = arith.constant 0 : index
    %112 = vector.load %arg6[%c0_38, %c0_39] : memref<32x32xbf16, #tpu.memory_space<vmem>>, vector<32x32xbf16>
    %cst_40 = arith.constant dense<0.000000e+00> : vector<8x32xf32>
    %113 = tpu.matmul %111, %112, %cst_40 {dimension_numbers = #tpu.dot_dimension_numbers<[1], [0], [0], [1], [0, 0, 1, 1], [], []>} : vector<8x32xbf16>, vector<32x32xbf16>, vector<8x32xf32> -> vector<8x32xf32>
    %c0_41 = arith.constant 0 : index
    %c0_42 = arith.constant 0 : index
    %114 = vector.load %arg7[%c0_41, %c0_42] : memref<1x32xf32, #tpu.memory_space<vmem>>, vector<1x32xf32>
    %115 = vector.broadcast %114 : vector<1x32xf32> to vector<8x32xf32>
    %116 = arith.addf %113, %115 : vector<8x32xf32>
    %117 = arith.addf %1, %116 : vector<8x32xf32>
    %c0_43 = arith.constant 0 : index
    %c0_44 = arith.constant 0 : index
    %118 = vector.load %arg8[%c0_43, %c0_44] : memref<1x32xf32, #tpu.memory_space<vmem>>, vector<1x32xf32>
    %c0_45 = arith.constant 0 : index
    %c0_46 = arith.constant 0 : index
    %119 = vector.load %arg9[%c0_45, %c0_46] : memref<1x32xf32, #tpu.memory_space<vmem>>, vector<1x32xf32>
    %cst_47 = arith.constant dense<0.000000e+00> : vector<8xf32>
    %120 = vector.multi_reduction <add>, %117, %cst_47 [1] : vector<8x32xf32> to vector<8xf32>
    %121 = vector.shape_cast %120 : vector<8xf32> to vector<8x1xf32>
    %cst_48 = arith.constant 3.200000e+01 : f32
    %122 = vector.broadcast %cst_48 : f32 to vector<8x1xf32>
    %123 = arith.divf %121, %122 : vector<8x1xf32>
    %124 = vector.broadcast %123 : vector<8x1xf32> to vector<8x32xf32>
    %125 = arith.subf %117, %124 : vector<8x32xf32>
    %126 = arith.mulf %125, %125 : vector<8x32xf32>
    %cst_49 = arith.constant dense<0.000000e+00> : vector<8xf32>
    %127 = vector.multi_reduction <add>, %126, %cst_49 [1] : vector<8x32xf32> to vector<8xf32>
    %128 = vector.shape_cast %127 : vector<8xf32> to vector<8x1xf32>
    %cst_50 = arith.constant 3.200000e+01 : f32
    %129 = vector.broadcast %cst_50 : f32 to vector<8x1xf32>
    %130 = arith.divf %128, %129 : vector<8x1xf32>
    %cst_51 = arith.constant 9.99999997E-7 : f32
    %131 = vector.broadcast %cst_51 : f32 to vector<8x1xf32>
    %132 = arith.addf %130, %131 : vector<8x1xf32>
    %133 = math.rsqrt %132 : vector<8x1xf32>
    %134 = vector.broadcast %133 : vector<8x1xf32> to vector<8x32xf32>
    %135 = arith.mulf %125, %134 : vector<8x32xf32>
    %136 = vector.broadcast %118 : vector<1x32xf32> to vector<8x32xf32>
    %137 = arith.mulf %135, %136 : vector<8x32xf32>
    %138 = vector.broadcast %119 : vector<1x32xf32> to vector<8x32xf32>
    %139 = arith.addf %137, %138 : vector<8x32xf32>
    %140 = arith.truncf %139 : vector<8x32xf32> to vector<8x32xbf16>
    %c0_52 = arith.constant 0 : index
    %c0_53 = arith.constant 0 : index
    %141 = vector.load %arg10[%c0_52, %c0_53] : memref<32x128xbf16, #tpu.memory_space<vmem>>, vector<32x128xbf16>
    %cst_54 = arith.constant dense<0.000000e+00> : vector<8x128xf32>
    %142 = tpu.matmul %140, %141, %cst_54 {dimension_numbers = #tpu.dot_dimension_numbers<[1], [0], [0], [1], [0, 0, 1, 1], [], []>} : vector<8x32xbf16>, vector<32x128xbf16>, vector<8x128xf32> -> vector<8x128xf32>
    %c0_55 = arith.constant 0 : index
    %c0_56 = arith.constant 0 : index
    %143 = vector.load %arg11[%c0_55, %c0_56] : memref<1x128xf32, #tpu.memory_space<vmem>>, vector<1x128xf32>
    %144 = vector.broadcast %143 : vector<1x128xf32> to vector<8x128xf32>
    %145 = arith.addf %142, %144 : vector<8x128xf32>
    %cst_57 = arith.constant 5.000000e-01 : f32
    %146 = vector.broadcast %cst_57 : f32 to vector<8x128xf32>
    %147 = arith.mulf %146, %145 : vector<8x128xf32>
    %cst_58 = arith.constant 0.707106769 : f32
    %148 = vector.broadcast %cst_58 : f32 to vector<8x128xf32>
    %149 = arith.mulf %145, %148 : vector<8x128xf32>
    %150 = math.absf %149 : vector<8x128xf32>
    %cst_59 = arith.constant 0.327591091 : f32
    %151 = vector.broadcast %cst_59 : f32 to vector<8x128xf32>
    %152 = arith.mulf %151, %150 : vector<8x128xf32>
    %cst_60 = arith.constant 1.000000e+00 : f32
    %153 = vector.broadcast %cst_60 : f32 to vector<8x128xf32>
    %154 = arith.addf %153, %152 : vector<8x128xf32>
    %155 = tpu.reciprocal %154 {approx = true} : vector<8x128xf32> -> vector<8x128xf32>
    %cst_61 = arith.constant 1.06140542 : f32
    %156 = vector.broadcast %cst_61 : f32 to vector<8x128xf32>
    %157 = arith.mulf %156, %155 : vector<8x128xf32>
    %cst_62 = arith.constant -1.45315206 : f32
    %158 = vector.broadcast %cst_62 : f32 to vector<8x128xf32>
    %159 = arith.addf %157, %158 : vector<8x128xf32>
    %160 = arith.mulf %159, %155 : vector<8x128xf32>
    %cst_63 = arith.constant 1.42141378 : f32
    %161 = vector.broadcast %cst_63 : f32 to vector<8x128xf32>
    %162 = arith.addf %160, %161 : vector<8x128xf32>
    %163 = arith.mulf %162, %155 : vector<8x128xf32>
    %cst_64 = arith.constant -0.284496725 : f32
    %164 = vector.broadcast %cst_64 : f32 to vector<8x128xf32>
    %165 = arith.addf %163, %164 : vector<8x128xf32>
    %166 = arith.mulf %165, %155 : vector<8x128xf32>
    %cst_65 = arith.constant 0.254829586 : f32
    %167 = vector.broadcast %cst_65 : f32 to vector<8x128xf32>
    %168 = arith.addf %166, %167 : vector<8x128xf32>
    %169 = arith.mulf %168, %155 : vector<8x128xf32>
    %cst_66 = arith.constant 0.000000e+00 : f32
    %170 = vector.broadcast %cst_66 : f32 to vector<8x128xf32>
    %171 = arith.subf %170, %150 : vector<8x128xf32>
    %172 = arith.mulf %171, %150 : vector<8x128xf32>
    %173 = math.exp %172 : vector<8x128xf32>
    %174 = arith.mulf %169, %173 : vector<8x128xf32>
    %cst_67 = arith.constant 1.000000e+00 : f32
    %175 = vector.broadcast %cst_67 : f32 to vector<8x128xf32>
    %176 = arith.subf %175, %174 : vector<8x128xf32>
    %cst_68 = arith.constant 0.000000e+00 : f32
    %177 = vector.broadcast %cst_68 : f32 to vector<8x128xf32>
    %178 = arith.cmpf oge, %149, %177 : vector<8x128xf32>
    %cst_69 = arith.constant 0.000000e+00 : f32
    %179 = vector.broadcast %cst_69 : f32 to vector<8x128xf32>
    %180 = arith.subf %179, %176 : vector<8x128xf32>
    %181 = arith.select %178, %176, %180 : vector<8x128xi1>, vector<8x128xf32>
    %cst_70 = arith.constant 1.000000e+00 : f32
    %182 = vector.broadcast %cst_70 : f32 to vector<8x128xf32>
    %183 = arith.addf %182, %181 : vector<8x128xf32>
    %184 = arith.mulf %147, %183 : vector<8x128xf32>
    %185 = arith.truncf %184 : vector<8x128xf32> to vector<8x128xbf16>
    %c0_71 = arith.constant 0 : index
    %c0_72 = arith.constant 0 : index
    %186 = vector.load %arg12[%c0_71, %c0_72] : memref<128x32xbf16, #tpu.memory_space<vmem>>, vector<128x32xbf16>
    %cst_73 = arith.constant dense<0.000000e+00> : vector<8x32xf32>
    %187 = tpu.matmul %185, %186, %cst_73 {dimension_numbers = #tpu.dot_dimension_numbers<[1], [0], [0], [1], [0, 0, 1, 1], [], []>} : vector<8x128xbf16>, vector<128x32xbf16>, vector<8x32xf32> -> vector<8x32xf32>
    %c0_74 = arith.constant 0 : index
    %c0_75 = arith.constant 0 : index
    %188 = vector.load %arg13[%c0_74, %c0_75] : memref<1x32xf32, #tpu.memory_space<vmem>>, vector<1x32xf32>
    %189 = vector.broadcast %188 : vector<1x32xf32> to vector<8x32xf32>
    %190 = arith.addf %187, %189 : vector<8x32xf32>
    %191 = arith.addf %117, %190 : vector<8x32xf32>
    %c0_76 = arith.constant 0 : index
    %c0_77 = arith.constant 0 : index
    %c0_78 = arith.constant 0 : index
    %192 = vector.load %arg14[%c0_76, %c0_77, %c0_78] : memref<1x8x32xf32, #tpu.memory_space<vmem>>, vector<1x8x32xf32>
    %193 = vector.shape_cast %192 : vector<1x8x32xf32> to vector<8x32xf32>
    %194 = vector.shape_cast %191 : vector<8x32xf32> to vector<1x8x32xf32>
    tpu.vector_store %arg14[%c0_76, %c0_77, %c0_78], %194 {strides = array<i32>} : memref<1x8x32xf32, #tpu.memory_space<vmem>>, vector<1x8x32xf32>,
    return
  }
  func.func @transform_0(%arg0: i32) -> (i32, i32, i32) {
    %c0_i32 = arith.constant 0 : i32
    %c0_i32_0 = arith.constant 0 : i32
    %c0_i32_1 = arith.constant 0 : i32
    return %arg0, %c0_i32, %c0_i32_0 : i32, i32, i32
  }
  func.func @transform_1(%arg0: i32) -> (i32, i32) {
    %c0_i32 = arith.constant 0 : i32
    %c0_i32_0 = arith.constant 0 : i32
    %c0_i32_1 = arith.constant 0 : i32
    return %c0_i32, %c0_i32_0 : i32, i32
  }
  func.func @transform_2(%arg0: i32) -> (i32, i32) {
    %c0_i32 = arith.constant 0 : i32
    %c0_i32_0 = arith.constant 0 : i32
    %c0_i32_1 = arith.constant 0 : i32
    return %c0_i32, %c0_i32_0 : i32, i32
  }
  func.func @transform_3(%arg0: i32) -> (i32, i32) {
    %c0_i32 = arith.constant 0 : i32
    %c0_i32_0 = arith.constant 0 : i32
    %c0_i32_1 = arith.constant 0 : i32
    return %c0_i32, %c0_i32_0 : i32, i32
  }
  func.func @transform_4(%arg0: i32) -> (i32, i32) {
    %c0_i32 = arith.constant 0 : i32
    %c0_i32_0 = arith.constant 0 : i32
    %c0_i32_1 = arith.constant 0 : i32
    return %c0_i32, %c0_i32_0 : i32, i32
  }
  func.func @transform_5(%arg0: i32) -> (i32, i32) {
    %c0_i32 = arith.constant 0 : i32
    %c0_i32_0 = arith.constant 0 : i32
    %c0_i32_1 = arith.constant 0 : i32
    return %c0_i32, %c0_i32_0 : i32, i32
  }
  func.func @transform_6(%arg0: i32) -> (i32, i32) {
    %c0_i32 = arith.constant 0 : i32
    %c0_i32_0 = arith.constant 0 : i32
    %c0_i32_1 = arith.constant 0 : i32
    return %c0_i32, %c0_i32_0 : i32, i32
  }
  func.func @transform_7(%arg0: i32) -> (i32, i32) {
    %c0_i32 = arith.constant 0 : i32
    %c0_i32_0 = arith.constant 0 : i32
    %c0_i32_1 = arith.constant 0 : i32
    return %c0_i32, %c0_i32_0 : i32, i32
  }
  func.func @transform_8(%arg0: i32) -> (i32, i32) {
    %c0_i32 = arith.constant 0 : i32
    %c0_i32_0 = arith.constant 0 : i32
    %c0_i32_1 = arith.constant 0 : i32
    return %c0_i32, %c0_i32_0 : i32, i32
  }
  func.func @transform_9(%arg0: i32) -> (i32, i32) {
    %c0_i32 = arith.constant 0 : i32
    %c0_i32_0 = arith.constant 0 : i32
    %c0_i32_1 = arith.constant 0 : i32
    return %c0_i32, %c0_i32_0 : i32, i32
  }
  func.func @transform_10(%arg0: i32) -> (i32, i32) {
    %c0_i32 = arith.constant 0 : i32
    %c0_i32_0 = arith.constant 0 : i32
    %c0_i32_1 = arith.constant 0 : i32
    return %c0_i32, %c0_i32_0 : i32, i32
  }
  func.func @transform_11(%arg0: i32) -> (i32, i32) {
    %c0_i32 = arith.constant 0 : i32
    %c0_i32_0 = arith.constant 0 : i32
    %c0_i32_1 = arith.constant 0 : i32
    return %c0_i32, %c0_i32_0 : i32, i32
  }
  func.func @transform_12(%arg0: i32) -> (i32, i32) {
    %c0_i32 = arith.constant 0 : i32
    %c0_i32_0 = arith.constant 0 : i32
    %c0_i32_1 = arith.constant 0 : i32
    return %c0_i32, %c0_i32_0 : i32, i32
  }
  func.func @transform_13(%arg0: i32) -> (i32, i32, i32) {
    %c0_i32 = arith.constant 0 : i32
    %c0_i32_0 = arith.constant 0 : i32
    %c0_i32_1 = arith.constant 0 : i32
    return %arg0, %c0_i32, %c0_i32_0 : i32, i32, i32
  }
}

</mosaic_0001>

<bundles_post_ra>
// kernel: tpu_custom_call.1
= control target key start
LH: loop header
LB: loop body
LE: loop exit
PB: predicated region body
PF: predicated region fallthrough
CT: control target
= control target key end

     0   :  { %s2057_s0 = inlined_call_operand.vmem [shape: f32[2,8,32], index: 0, kind: input, shape index: {}]   ;;  %s2058_s1 = inlined_call_operand.vmem [shape: f32[1,32], index: 1, kind: input, shape index: {}]   ;;  %s2059_s2 = inlined_call_operand.vmem [shape: f32[1,32], index: 2, kind: input, shape index: {}]   ;;  %s2060_s3 = inlined_call_operand.vmem [shape: bf16[32,96], index: 3, kind: input, shape index: {}]   ;;  %s2061_s4 = inlined_call_operand.vmem [shape: f32[1,96], index: 4, kind: input, shape index: {}]   ;;  %s2062_s5 = inlined_call_operand.vmem [shape: bf16[32,32], index: 5, kind: input, shape index: {}]   ;;  %s2063_s6 = inlined_call_operand.vmem [shape: f32[1,32], index: 6, kind: input, shape index: {}]   ;;  %s2064_s7 = inlined_call_operand.vmem [shape: f32[1,32], index: 7, kind: input, shape index: {}]   ;;  %s2065_s8 = inlined_call_operand.vmem [shape: f32[1,32], index: 8, kind: input, shape index: {}]   ;;  %s2066_s9 = inlined_call_operand.vmem [shape: bf16[32,128], index: 9, kind: input, shape index: {}]   ;;  %s2067_s10 = inlined_call_operand.vmem [shape: f32[1,128], index: 10, kind: input, shape index: {}]   ;;  %s2068_s11 = inlined_call_operand.vmem [shape: bf16[128,32], index: 11, kind: input, shape index: {}]   ;;  %s2069_s12 = inlined_call_operand.vmem [shape: f32[1,32], index: 12, kind: input, shape index: {}]   ;;  %s2070_s13 = inlined_call_operand.hbm [shape: f32[2,8,32], index: 13, kind: output, shape index: {}]  }
   0x1   :  { %2071 = sst [smem:[#allocation6_spill]] %s2057_s0 }
   0x2   :  { %2072 = sst [smem:[#allocation7_spill]] %s2058_s1 }
   0x3   :  { %2073 = sst [smem:[#allocation8_spill]] %s2059_s2 }
   0x4   :  { %18 = vsyncpa [#allocation4], 0 }
   0x5   :  { %20 = vsyncpa [#allocation4 + $0x1], 0  ;;  %s1788_s25 = smov 0   ;;  %s1790_s26 = smov 0  }
   0x6   :  { %s1792_s27 = smov 0   ;;  %s1794_s28 = smov 0  }
   0x7 LB: > { %s1809_s29 = sadd.s32 4294967295, %s1699_s28   ;;  %s1375_s30 = sadd.s32 4294967294, %s1699_s28   ;;  %s1699_s28 = sphi %s1794_s28, %s2082_s28   ;;  %s1695_s27 = sphi %s1792_s27, %s2081_s27   ;;  %s1691_s26 = sphi %s1790_s26, %s2080_s26   ;;  %s1687_s25 = sphi %s1788_s25, %s2079_s25  }
   0x8   : > { %s1813_s14 = sadd.s32 1, %s1699_s28   ;;  %s311_s15 = sadd.s32 1, %s1695_s27 }
   0x9   : > { %s308_s16 = ssub.s32 %s1699_s28, %s1813_s14  ;;  %p321_p0 = scmp.ne.s32.totalorder %s1695_s27, %s1691_s26 }
   0xa   : > { %p309_p1 = scmp.eq.s32.totalorder %s308_s16, 0  ;;  %p322_p2 = scmp.eq.s32.totalorder %s1809_s29, 1 }
   0xb   : > { %p327_p3 = scmp.ne.s32.totalorder %s1691_s26, %s1687_s25  ;;  %p328_p4 = scmp.eq.s32.totalorder %s1375_s30, 1 }
   0xc   : > { %s1824_s17 = scalar_select %p309_p1, %s1695_s27, %s311_s15  }
   0xd   : > { %p1826_p5 = por %p322_p2, %p321_p0  ;;  %p1830_p6 = por %p328_p4, %p327_p3 }
   0xe   : > { %p1378_p7 = scmp.ge.s32.totalorder %s1699_s28, 1  ;;  %p389_p8 = scmp.lt.s32.totalorder %s1699_s28, 3 }
  0x10   : > { %p390_p9 = pnand %p1378_p7, %p389_p8 }
  0x11   : > { %p432_p10 = scmp.lt.s32.totalorder (!%p390_p9), %s1809_s29, 1  ;;  %vm440_vm0 = vcmask (!%p390_p9), 261120   ;;  %s2076_s0 = sld [smem:[#allocation6_spill]] (!%p390_p9)  ;;  %v1599_v7 = vld [vmem:[%s2060_s3] sm:$0xff] (!%p390_p9)   ;;  %v1701_v8 = vmov (!%p390_p9), 0.0   ;;  %vm1702_vm1 = vmmov (!%p390_p9), 0  }
  0x12   : > { %393 = sbr.rel (%p390_p9) target bundleno = 2635 (0xa4b), region = 72  ;;  %1452 = vmatprep.subr.bf16.mxu0 (!%p390_p9), %v1701_v8  ;;  %1456 = vmatprep.mubr.msk.bf16.mxu0 (!%p390_p9), %vm1702_vm1, %v1701_v8  ;;  %v1600_v9 = vld [vmem:[%s2060_s3 + $0x8] sm:$0xff] (!%p390_p9)   ;;  %s2077_s1 = sld [smem:[#allocation7_spill]] (!%p390_p9)  ;;  %v1383_v20 = vld [vmem:[%s2061_s4] ss:$0 sm:$0xff] (!%p390_p9)  ;;  %vm540_vm2 = vcmask (!%p390_p9), 64512  }
  0x13   : > { %1453 = vmatpush3.bf16.msra.mxu0 (!%p390_p9), %v1599_v7  ;;  %1472 = vmatprep.subr.bf16.mxu1 (!%p390_p9), %v1701_v8  ;;  %s2078_s2 = sld [smem:[#allocation8_spill]] (!%p390_p9)  ;;  %s1703_s16 = smov (!%p390_p9), 120   ;;  %vm604_vm3 = vcmask (!%p390_p9), 1043456   ;;  %vm763_vm4 = vcmask (!%p390_p9), 130112   ;;  %vm879_vm5 = vcmask (!%p390_p9), 195712   ;;  %vm995_vm6 = vcmask (!%p390_p9), 261312  }
  0x14   : > { %1454 = vmatprep.subr.bf16.mxu0 (!%p390_p9), %v1701_v8  ;;  %1474 = vmatprep.mubr.msk.bf16.mxu1 (!%p390_p9), %vm1702_vm1, %v1701_v8  ;;  %s1706_s22 = smov (!%p390_p9), 80   ;;  %s1707_s23 = smov (!%p390_p9), 112  }
  0x15   : > { %s1709_s30 = smov (!%p390_p9), 104   ;;  %s1710_s15 = smov (!%p390_p9), 64  }
  0x17   : > { %1455 = vmatpush3.bf16.msra.mxu0 (!%p390_p9), %v1600_v9 }
  0x18   : > { %1460 = vmatprep.subr.bf16.mxu0 (!%p390_p9), %v1701_v8  ;;  %v1381_v14 = vld [vmem:[%s2077_s1] ss:$0 sm:$0xff] (!%p390_p9) }
  0x19   : > { %s433_s20 = scalar_select %p432_p10, %s1809_s29, 1  ;;  %v1382_v16 = vld [vmem:[%s2078_s2] ss:$0 sm:$0xff] }
  0x1b   : > { %s1380_s21 = sshll.u32 %s433_s20, 3  ;;  %s1704_s20 = smov 96  }
  0x1c   : > { %s435_s24 = scalar_lea.vmem %s2076_s0, %s1380_s21  ;;  %s1705_s21 = smov 88  }
  0x1d   : > { %v1841_v0 = vld [vmem:[%s435_s24] sm:$0xff]  ;;  %s1708_s24 = smov 72  }
  0x1e   : > { %v441_v1 = vsel %vm440_vm0, %v1841_v0, 0.0 }
  0x1f   : > { %442 = vadd.xlane.f32.xlu0 %v441_v1 }
  0xac   : > { %v443_v2 = vpop.xlane.xlu0 %442 }
  0xad   : > { %v445_v3 = vmul.f32 0.03125, %v443_v2 }
  0xaf   : > { %v446_v4 = vsub.f32 %v1841_v0, %v445_v3 }
  0xb1   : > { %v447_v5 = vmul.f32 %v446_v4, %v446_v4 }
  0xb3   : > { %v448_v6 = vsel %vm440_vm0, %v447_v5, 0.0 }
  0xb4   : > { %449 = vadd.xlane.f32.xlu0 %v448_v6 }
 0x141   : > { %v450_v10 = vpop.xlane.xlu0 %449 }
 0x142   : > { %v451_v11 = vmul.f32 0.03125, %v450_v10 }
 0x144   : > { %v452_v12 = vadd.f32 1e-06, %v451_v11 }
 0x146   : > { %1613 = vrsqrt.f32 %v452_v12 }
 0x150   : > { %v1614_v13 = vpop.eup %1613 }
 0x151   : > { %v454_v15 = vmul.f32 %v1614_v13, %v446_v4 }
 0x153   : > { %v461_v17 = vmul.f32 %v1381_v14, %v454_v15 }
 0x155   : > { %v468_v18 = vadd.f32 %v1382_v16, %v461_v17 }
 0x157   : > { %v469_v19 = vpack.c.bf16 %v468_v18, %v468_v18 }
 0x159   : > { %1457 = vmatmul.mubr.msk.bf16.vlgmr.msra.gmra.mrb[0].mxu0 %vm440_vm0, %v469_v19 }
 0x15a   : > { %1462 = vmatprep.mubr.msk.bf16.mxu0 %vm1702_vm1, %v1701_v8 }
 0x22c   : > { %v530_v21 = vpop.f32.mrb[0].mxu0 }
 0x22d   : > { %v531_v22 = vadd.f32 %v1383_v20, %v530_v21  ;;  %v1458_v23 = vpop.f32.mrb[1].mxu0 }
 0x22e   : > { %v533_v24 = vpop.f32.mrb[2].mxu0 }
 0x22f   : > { %v1873_v25 = vpack.c.bf16 %v531_v22, %v531_v22  ;;  %v1459_v26 = vpop.f32.mrb[3].mxu0 }
 0x231   : > { %649 = vrot.lane.b32.xlu0 %v1873_v25, %s1703_s16  ;;  %538 = vrot.lane.b32.xlu1 %v1873_v25, %s1704_s20  ;;  %s1711_s16 = smov 56   ;;  %s1712_s20 = smov 48  }
 0x235   : > { %651 = vrot.lane.b32.xlu1 %v1873_v25, %s1705_s21  ;;  %s1713_s21 = smov 40  }
 0x239   : > { %767 = vrot.lane.b32.xlu1 %v1873_v25, %s1706_s22  ;;  %s1714_s22 = smov 8  }
 0x23d   : > { %765 = vrot.lane.b32.xlu1 %v1873_v25, %s1707_s23 }
 0x241   : > { %883 = vrot.lane.b32.xlu1 %v1873_v25, %s1708_s24 }
 0x245   : > { %881 = vrot.lane.b32.xlu1 %v1873_v25, %s1709_s30  ;;  %s429_s30 = sand.u32 1, %s1691_s26  }
 0x2a3   : > { %v539_v27 = vpop.permute.xlu1 %538  ;;  %v650_v32 = vpop.permute.xlu0 %649 }
 0x2a4   : > { %v545_v28 = vsel %vm540_vm2, %v539_v27, 0 }
 0x2a5   : > { %1461 = vmatpush3.bf16.xpose.msra.mxu0 %v545_v28 }
 0x2a6   : > { %1466 = vmatprep.subr.bf16.mxu0 %v1701_v8 }
 0x2a7   : > { %v652_v29 = vpop.permute.xlu1 %651 }
 0x2a8   : > { %v657_v30 = vsel %vm540_vm2, %v652_v29, 0 }
 0x2a9   : > { %1473 = vmatpush3.bf16.xpose.msra.mxu1 %v657_v30 }
 0x2aa   : > { %1484 = vmatprep.subr.bf16.mxu1 %v1701_v8 }
 0x2ab   : > { %v768_v31 = vpop.permute.xlu1 %767 }
 0x2ac   : > { %1463 = vmatmul.mubr.msk.bf16.vlgmr.msra.gmra.mrb[4].mxu0 %vm540_vm2, %v1873_v25  ;;  %v773_v34 = vsel %vm540_vm2, %v768_v31, 0 }
 0x2ad   : > { %1468 = vmatprep.mubr.msk.bf16.mxu0 %vm1702_vm1, %v1701_v8 }
 0x2af   : > { %v766_v33 = vpop.permute.xlu1 %765 }
 0x2b0   : > { %1475 = vmatmul.mubr.msk.bf16.vlgmr.msra.gmra.mrb[0].mxu1 %vm540_vm2, %v650_v32 }
 0x2b1   : > { %1485 = vmatpush3.bf16.xpose.msra.mxu1 %v773_v34  ;;  %1486 = vmatprep.mubr.msk.bf16.mxu1 %vm1702_vm1, %v1701_v8 }
 0x2b2   : > { %1496 = vmatprep.subr.bf16.mxu1 %v1701_v8 }
 0x2b3   : > { %v884_v35 = vpop.permute.xlu1 %883 }
 0x2b4   : > { %v889_v36 = vsel %vm540_vm2, %v884_v35, 0 }
 0x2b7   : > { %v882_v37 = vpop.permute.xlu1 %881 }
 0x2b8   : > { %1487 = vmatmul.mubr.msk.bf16.vlgmr.msra.gmra.mrb[4].mxu1 %vm540_vm2, %v766_v33 }
 0x2b9   : > { %1497 = vmatpush3.bf16.xpose.msra.mxu1 %v889_v36  ;;  %1498 = vmatprep.mubr.msk.bf16.mxu1 %vm1702_vm1, %v1701_v8 }
 0x2ba   : > { %1508 = vmatprep.subr.bf16.mxu1 %v1701_v8 }
 0x2c0   : > { %1499 = vmatmul.mubr.msk.bf16.vlgmr.msra.gmra.mrb[8].mxu1 %vm540_vm2, %v882_v37 }
 0x2c1   : > { %1512 = vmatprep.mubr.msk.bf16.mxu1 %vm1702_vm1, %v1701_v8 }
 0x37f   : > { %v581_v38 = vpop.f32.mrb[4].mxu0 }
 0x380   : > { %v1464_v39 = vpop.f32.mrb[5].mxu0  ;;  %v587_v40 = vsel %vm540_vm2, %v581_v38, -inf }
 0x381   : > { %588 = vmax.xlane.f32.xlu1 %v587_v40  ;;  %v584_v41 = vpop.f32.mrb[6].mxu0 }
 0x382   : > { %v1465_v42 = vpop.f32.mrb[7].mxu0 }
 0x383   : > { %v693_v43 = vpop.f32.mrb[0].mxu1 }
 0x384   : > { %v1476_v44 = vpop.f32.mrb[1].mxu1  ;;  %v699_v45 = vsel %vm540_vm2, %v693_v43, -inf }
 0x385   : > { %700 = vmax.xlane.f32.xlu0 %v699_v45  ;;  %v696_v46 = vpop.f32.mrb[2].mxu1 }
 0x386   : > { %v1477_v47 = vpop.f32.mrb[3].mxu1 }
 0x38b   : > { %v809_v48 = vpop.f32.mrb[4].mxu1 }
 0x38c   : > { %v1488_v49 = vpop.f32.mrb[5].mxu1  ;;  %v815_v50 = vsel %vm540_vm2, %v809_v48, -inf }
 0x38d   : > { %v812_v51 = vpop.f32.mrb[6].mxu1  ;;  %816 = vmax.xlane.f32.xlu1 %v815_v50  ;;  %v1602_v49 = vld [vmem:[%s2062_s5 + $0x8] sm:$0xff]  }
 0x38e   : > { %v1489_v52 = vpop.f32.mrb[7].mxu1 }
 0x393   : > { %v925_v53 = vpop.f32.mrb[8].mxu1 }
 0x394   : > { %v1500_v54 = vpop.f32.mrb[9].mxu1  ;;  %v931_v55 = vsel %vm540_vm2, %v925_v53, -inf }
 0x395   : > { %932 = vmax.xlane.f32.xlu0 %v931_v55  ;;  %v928_v56 = vpop.f32.mrb[10].mxu1 }
 0x396   : > { %v1501_v57 = vpop.f32.mrb[11].mxu1 }
 0x40e   : > { %v589_v58 = vpop.xlane.xlu1 %588 }
 0x40f   : > { %v590_v59 = vsub.f32 %v581_v38, %v589_v58 }
 0x411   : > { %v591_v60 = vmul.f32 1.442695, %v590_v59 }
 0x412   : > { %v701_v61 = vpop.xlane.xlu0 %700 }
 0x413   : > { %1615 = vpow2.f32 %v591_v60  ;;  %v702_v62 = vsub.f32 %v693_v43, %v701_v61 }
 0x415   : > { %v703_v63 = vmul.f32 1.442695, %v702_v62 }
 0x417   : > { %1617 = vpow2.f32 %v703_v63  ;;  %v1395_v63 = vld [vmem:[%s2063_s6] ss:$0 sm:$0xff] }
 0x41a   : > { %v817_v11 = vpop.xlane.xlu1 %816 }
 0x41b   : > { %v818_v12 = vsub.f32 %v809_v48, %v817_v11  ;;  %v1601_v48 = vld [vmem:[%s2062_s5] sm:$0xff]  }
 0x41c   : > { %1509 = vmatpush3.bf16.msra.mxu1 %v1601_v48 }
 0x41d   : > { %v1616_v1 = vpop.eup %1615  ;;  %v819_v13 = vmul.f32 1.442695, %v818_v12  ;;  %1510 = vmatprep.subr.bf16.mxu1 %v1701_v8 }
 0x41e   : > { %v593_v2 = vsel %vm540_vm2, %v1616_v1, 0.0 }
 0x41f   : > { %594 = vadd.xlane.f32.xlu1 %v593_v2 }
 0x420   : > { %1511 = vmatpush3.bf16.msra.mxu1 %v1602_v49 }
 0x421   : > { %v1618_v3 = vpop.eup %1617  ;;  %1524 = vmatprep.subr.bf16.mxu1 %v1701_v8 }
 0x422   : > { %v933_v4 = vpop.xlane.xlu0 %932  ;;  %v705_v5 = vsel %vm540_vm2, %v1618_v3, 0.0 }
 0x423   : > { %v934_v6 = vsub.f32 %v925_v53, %v933_v4  ;;  %706 = vadd.xlane.f32.xlu0 %v705_v5 }
 0x425   : > { %v935_v7 = vmul.f32 1.442695, %v934_v6 }
 0x427   : > { %1619 = vpow2.f32 %v935_v7 }
 0x428   : > { %1621 = vpow2.f32 %v819_v13 }
 0x430   : > { %599 = vrot.lane.b32.xlu1 %v1873_v25, %s1710_s15  ;;  %s1379_s15 = sshll.u32 %s429_s30, 3 }
 0x431   : > { %v1620_v9 = vpop.eup %1619 }
 0x432   : > { %v937_v10 = vsel %vm540_vm2, %v1620_v9, 0.0  ;;  %v1622_v14 = vpop.eup %1621 }
 0x433   : > { %938 = vadd.xlane.f32.xlu0 %v937_v10  ;;  %v821_v15 = vsel %vm540_vm2, %v1622_v14, 0.0 }
 0x449   : > { %711 = vrot.lane.b32.xlu0 %v1873_v25, %s1711_s16  ;;  %s1715_s16 = smov 16  }
 0x454   : > { %822 = vadd.xlane.f32.xlu1 %v821_v15 }
 0x465   : > { %827 = vrot.lane.b32.xlu1 %v1873_v25, %s1712_s20  ;;  %s1716_s20 = smov 24  }
 0x469   : > { %943 = vrot.lane.b32.xlu1 %v1873_v25, %s1713_s21  ;;  %s1415_s21 = sshll.u32 %s1809_s29, 7  ;;  %s1303_s29 = scalar_lea.sflag [#allocation4], %s429_s30 }
 0x46a   : > { %s2014_s1 = scalar_lea.hbm %s2070_s13, %s1415_s21 }
 0x4ac   : > { %v595_v16 = vpop.xlane.xlu1 %594 }
 0x4ad   : > { %1623 = vrcp.f32 %v595_v16 }
 0x4b0   : > { %v600_v17 = vpop.permute.xlu1 %599  ;;  %v707_v19 = vpop.xlane.xlu0 %706 }
 0x4b1   : > { %v606_v18 = vsel %vm604_vm3, %v600_v17, 0  ;;  %1625 = vrcp.f32 %v707_v19  ;;  %v1399_v19 = vld [vmem:[%s2064_s7] ss:$0 sm:$0xff] }
 0x4b2   : > { %1467 = vmatpush3.bf16.msra.mxu0 %v606_v18 }
 0x4b3   : > { %1478 = vmatprep.subr.bf16.mxu0 %v1701_v8 }
 0x4b7   : > { %v1624_v20 = vpop.eup %1623 }
 0x4b8   : > { %v597_v21 = vmul.f32 %v1624_v20, %v1616_v1 }
 0x4ba   : > { %v598_v22 = vpack.c.bf16 %v597_v21, %v597_v21  ;;  %v1400_v21 = vld [vmem:[%s2065_s8] ss:$0 sm:$0xff] }
 0x4bb   : > { %v1626_v23 = vpop.eup %1625 }
 0x4bc   : > { %1469 = vmatmul.mubr.msk.bf16.vlgmr.msra.gmra.mrb[8].mxu0 %vm540_vm2, %v598_v22  ;;  %v709_v25 = vmul.f32 %v1626_v23, %v1618_v3 }
 0x4bd   : > { %1480 = vmatprep.mubr.msk.bf16.mxu0 %vm1702_vm1, %v1701_v8 }
 0x4be   : > { %v710_v28 = vpack.c.bf16 %v709_v25, %v709_v25  ;;  %v1605_v25 = vld [vmem:[%s2068_s11] sm:$0xff]  }
 0x4c0   : > { %v939_v24 = vpop.xlane.xlu0 %938 }
 0x4c4   : > { %v712_v26 = vpop.permute.xlu0 %711 }
 0x4c5   : > { %v717_v27 = vsel %vm604_vm3, %v712_v26, 0  ;;  %v1606_v26 = vld [vmem:[%s2068_s11 + $0x8] sm:$0xff]  }
 0x4c6   : > { %1479 = vmatpush3.bf16.msra.mxu0 %v717_v27  ;;  %v1607_v27 = vld [vmem:[%s2068_s11 + $0x10] sm:$0xff]  }
 0x4c7   : > { %1490 = vmatprep.subr.bf16.mxu0 %v1701_v8 }
 0x4c9   : > { %1481 = vmatmul.mubr.msk.bf16.vlgmr.msra.gmra.mrb[12].mxu0 %vm540_vm2, %v710_v28  ;;  %v1608_v28 = vld [vmem:[%s2068_s11 + $0x18] sm:$0xff]  }
 0x4ca   : > { %1492 = vmatprep.mubr.msk.bf16.mxu0 %vm1702_vm1, %v1701_v8 }
 0x4e1   : > { %v823_v29 = vpop.xlane.xlu1 %822 }
 0x4e2   : > { %1627 = vrcp.f32 %v823_v29  ;;  %v1609_v29 = vld [vmem:[%s2068_s11 + $0x20] sm:$0xff]  }
 0x4e3   : > { %1629 = vrcp.f32 %v939_v24 }
 0x4e5   : > { %v828_v30 = vpop.permute.xlu1 %827 }
 0x4e6   : > { %v833_v31 = vsel %vm604_vm3, %v828_v30, 0  ;;  %v1610_v30 = vld [vmem:[%s2068_s11 + $0x28] sm:$0xff]  }
 0x4e7   : > { %1491 = vmatpush3.bf16.msra.mxu0 %v833_v31  ;;  %v1611_v31 = vld [vmem:[%s2068_s11 + $0x30] sm:$0xff]  }
 0x4e8   : > { %1502 = vmatprep.subr.bf16.mxu0 %v1701_v8 }
 0x4e9   : > { %v944_v34 = vpop.permute.xlu1 %943 }
 0x4ea   : > { %v949_v37 = vsel %vm604_vm3, %v944_v34, 0 }
 0x4ec   : > { %v1628_v32 = vpop.eup %1627 }
 0x4ed   : > { %v825_v33 = vmul.f32 %v1628_v32, %v1622_v14  ;;  %v1630_v36 = vpop.eup %1629  ;;  %v1603_v14 = vld [vmem:[%s2066_s9] sm:$0xff]   ;;  %v1612_v32 = vld [vmem:[%s2068_s11 + $0x38] sm:$0xff]  }
 0x4ee   : > { %v941_v38 = vmul.f32 %v1630_v36, %v1620_v9 }
 0x4ef   : > { %v826_v35 = vpack.c.bf16 %v825_v33, %v825_v33  ;;  %v1401_v33 = vld [vmem:[%s2067_s10] ss:$0 sm:$0xff] }
 0x4f0   : > { %v942_v39 = vpack.c.bf16 %v941_v38, %v941_v38 }
 0x4f1   : > { %1493 = vmatmul.mubr.msk.bf16.vlgmr.msra.gmra.mrb[16].mxu0 %vm540_vm2, %v826_v35 }
 0x4f2   : > { %1503 = vmatpush3.bf16.msra.mxu0 %v949_v37  ;;  %1504 = vmatprep.mubr.msk.bf16.mxu0 %vm1702_vm1, %v1701_v8 }
 0x4f3   : > { %1516 = vmatprep.subr.bf16.mxu0 %v1701_v8 }
 0x4f9   : > { %1505 = vmatmul.mubr.msk.bf16.vlgmr.msra.gmra.mrb[20].mxu0 %vm540_vm2, %v942_v39 }
 0x4fa   : > { %1520 = vmatprep.mubr.msk.bf16.mxu0 %vm1702_vm1, %v1701_v8  ;;  %1517 = vmatpush3.bf16.msra.mxu0 %v1603_v14 }
 0x4fb   : > { %1518 = vmatprep.subr.bf16.mxu0 %v1701_v8 }
 0x58f   : > { %v642_v40 = vpop.f32.mrb[8].mxu0 }
 0x590   : > { %648 = vst.msk [vmem:[#allocation2] sm:$0xff] %vm540_vm2, %v642_v40  ;;  %v1470_v41 = vpop.f32.mrb[9].mxu0 }
 0x591   : > { %v645_v42 = vpop.f32.mrb[10].mxu0 }
 0x592   : > { %v1471_v43 = vpop.f32.mrb[11].mxu0 }
 0x59c   : > { %v753_v44 = vpop.f32.mrb[12].mxu0 }
 0x59d   : > { %760 = vrot.lane.b32.xlu0 %v753_v44, %s1714_s22  ;;  %v1482_v45 = vpop.f32.mrb[13].mxu0  ;;  %s431_s22 = scalar_lea.vmem [#allocation3], %s1379_s15 }
 0x59e   : > { %v756_v46 = vpop.f32.mrb[14].mxu0  ;;  %s1316_s23 = sshll.u32 %s431_s22, 4  ;;  %s2016_s23 = int_to_ptr.vmem [resolvable:$true] %s1316_s23 }
 0x59f   : > { %v1483_v47 = vpop.f32.mrb[15].mxu0  ;;  %s1637_s15 = scalar_lea.vmem %s2016_s23, 128 }
 0x5a0   : > { %p1638_p11 = scmp.ne.s32.totalorder %s2016_s23, %s1637_s15 }
 0x5a2   : > { %p1639_p12 = pnand %p1638_p11, %p1826_p5 }
 0x5a4   : > { %p1640_p13 = pneg %p1639_p12 }
 0x5c4   : > { %v869_v50 = vpop.f32.mrb[16].mxu0 }
 0x5c5   : > { %876 = vrot.lane.b32.xlu1 %v869_v50, %s1715_s16  ;;  %v1494_v51 = vpop.f32.mrb[17].mxu0  ;;  %s1717_s16 = smov [#allocation3]  }
 0x5c6   : > { %v872_v52 = vpop.f32.mrb[18].mxu0 }
 0x5c7   : > { %v1495_v53 = vpop.f32.mrb[19].mxu0 }
 0x5cc   : > { %v985_v54 = vpop.f32.mrb[20].mxu0 }
 0x5cd   : > { %992 = vrot.lane.b32.xlu0 %v985_v54, %s1716_s20  ;;  %v1506_v55 = vpop.f32.mrb[21].mxu0  ;;  %s1641_s20 = sshll.u32 %s1717_s16, 4  ;;  %s1642_s20 = int_to_ptr.vmem [resolvable:$false] %s1641_s20 }
 0x5ce   : > { %v988_v56 = vpop.f32.mrb[22].mxu0  ;;  %s1643_s2 = scalar_lea.vmem %s1642_s20, 256  ;;  %p1644_p0 = scmp.lt.s32.totalorder %s2016_s23, %s1642_s20 }
 0x5cf   : > { %v1507_v57 = vpop.f32.mrb[23].mxu0  ;;  %p1645_p1 = scmp.lt.s32.totalorder %s1643_s2, %s1637_s15 }
 0x5d1   : > { %p1646_p2 = por %p1645_p1, %p1644_p0 }
 0x5d3   : > { %p1647_p3 = pnand %p1646_p2, %p1640_p13 }
 0x60f   : > { %v761_v58 = vpop.permute.xlu0 %760 }
 0x610   : > { %764 = vst.msk [vmem:[#allocation2] sm:$0xff] %vm763_vm4, %v761_v58 }
 0x637   : > { %v877_v59 = vpop.permute.xlu1 %876 }
 0x638   : > { %880 = vst.msk [vmem:[#allocation2] sm:$0xff] %vm879_vm5, %v877_v59 }
 0x63f   : > { %v993_v60 = vpop.permute.xlu0 %992 }
 0x640   : > { %996 = vst.msk [vmem:[#allocation2] sm:$0xff] %vm995_vm6, %v993_v60 }
 0x647   : > { %v997_v61 = vld [vmem:[#allocation2] sm:$0xff] }
 0x648   : > { %v998_v62 = vpack.c.bf16 %v997_v61, %v997_v61 }
 0x64a   : > { %1513 = vmatmul.mubr.msk.bf16.vlgmr.msra.gmra.mrb[12].mxu1 %vm440_vm0, %v998_v62 }
 0x64b   : > { %1540 = vmatprep.mubr.msk.bf16.mxu1 %vm1702_vm1, %v1701_v8  ;;  %1525 = vmatpush3.bf16.msra.mxu1 %v1605_v25 }
 0x64c   : > { %1526 = vmatprep.subr.bf16.mxu1 %v1701_v8 }
 0x64f   : > { %1527 = vmatpush3.bf16.msra.mxu1 %v1606_v26 }
 0x650   : > { %1528 = vmatprep.subr.bf16.mxu1 %v1701_v8 }
 0x653   : > { %1529 = vmatpush3.bf16.msra.mxu1 %v1607_v27 }
 0x654   : > { %1530 = vmatprep.subr.bf16.mxu1 %v1701_v8 }
 0x657   : > { %1531 = vmatpush3.bf16.msra.mxu1 %v1608_v28 }
 0x658   : > { %1532 = vmatprep.subr.bf16.mxu1 %v1701_v8 }
 0x65b   : > { %1533 = vmatpush3.bf16.msra.mxu1 %v1609_v29 }
 0x65c   : > { %1534 = vmatprep.subr.bf16.mxu1 %v1701_v8 }
 0x65f   : > { %1535 = vmatpush3.bf16.msra.mxu1 %v1610_v30 }
 0x660   : > { %1536 = vmatprep.subr.bf16.mxu1 %v1701_v8 }
 0x663   : > { %1537 = vmatpush3.bf16.msra.mxu1 %v1611_v31 }
 0x664   : > { %1538 = vmatprep.subr.bf16.mxu1 %v1701_v8 }
 0x667   : > { %1539 = vmatpush3.bf16.msra.mxu1 %v1612_v32 }
 0x71d   : > { %v1059_v1 = vpop.f32.mrb[12].mxu1 }
 0x71e   : > { %v1060_v2 = vadd.f32 %v1395_v63, %v1059_v1  ;;  %v1514_v3 = vpop.f32.mrb[13].mxu1  ;;  %v1405_v1 = vld [vmem:[%s2069_s12] ss:$0 sm:$0xff] }
 0x71f   : > { %v1062_v4 = vpop.f32.mrb[14].mxu1 }
 0x720   : > { %v1951_v5 = vadd.f32 %v1060_v2, %v1841_v0  ;;  %v1515_v6 = vpop.f32.mrb[15].mxu1  ;;  %v1604_v0 = vld [vmem:[%s2066_s9 + $0x8] sm:$0xff]  }
 0x721   : > { %1519 = vmatpush3.bf16.msra.mxu0 %v1604_v0 }
 0x722   : > { %v1068_v7 = vsel %vm440_vm0, %v1951_v5, 0.0 }
 0x723   : > { %1069 = vadd.xlane.f32.xlu1 %v1068_v7 }
 0x7b0   : > { %v1070_v9 = vpop.xlane.xlu1 %1069 }
 0x7b1   : > { %v1071_v10 = vmul.f32 0.03125, %v1070_v9 }
 0x7b3   : > { %v1072_v11 = vsub.f32 %v1951_v5, %v1071_v10 }
 0x7b5   : > { %v1073_v12 = vmul.f32 %v1072_v11, %v1072_v11 }
 0x7b7   : > { %v1074_v13 = vsel %vm440_vm0, %v1073_v12, 0.0 }
 0x7b8   : > { %1075 = vadd.xlane.f32.xlu0 %v1074_v13 }
 0x845   : > { %v1076_v15 = vpop.xlane.xlu0 %1075 }
 0x846   : > { %v1077_v16 = vmul.f32 0.03125, %v1076_v15 }
 0x848   : > { %v1078_v17 = vadd.f32 1e-06, %v1077_v16 }
 0x84a   : > { %1631 = vrsqrt.f32 %v1078_v17 }
 0x854   : > { %v1632_v18 = vpop.eup %1631 }
 0x855   : > { %v1080_v20 = vmul.f32 %v1632_v18, %v1072_v11 }
 0x857   : > { %v1087_v22 = vmul.f32 %v1399_v19, %v1080_v20 }
 0x859   : > { %v1094_v23 = vadd.f32 %v1400_v21, %v1087_v22 }
 0x85b   : > { %v1095_v24 = vpack.c.bf16 %v1094_v23, %v1094_v23 }
 0x85d   : > { %1521 = vmatmul.mubr.msk.bf16.vlgmr.msra.gmra.mrb[24].mxu0 %vm440_vm0, %v1095_v24 }
 0x930   : > { %v1156_v34 = vpop.f32.mrb[24].mxu0 }
 0x931   : > { %v1157_v35 = vadd.f32 %v1401_v33, %v1156_v34  ;;  %v1522_v36 = vpop.f32.mrb[25].mxu0 }
 0x932   : > { %v1159_v37 = vpop.f32.mrb[26].mxu0 }
 0x933   : > { %v1163_v38 = vmul.f32 0.70710677, %v1157_v35  ;;  %v1523_v39 = vpop.f32.mrb[27].mxu0  ;;  %v1162_v60 = vmul.f32 0.5, %v1157_v35 }
 0x935   : > { %v1164_v40 = vand.u32 2147483647, %v1163_v38  ;;  %vm1183_vm7 = vcmp.ge.f32.partialorder %v1163_v38, 0.0 }
 0x937   : > { %v1165_v41 = vmul.f32 0.3275911, %v1164_v40  ;;  %v1177_v8 = vsub.f32 0.0, %v1164_v40 }
 0x939   : > { %v1166_v42 = vadd.f32 1.0, %v1165_v41  ;;  %v1178_v44 = vmul.f32 %v1177_v8, %v1164_v40 }
 0x93b   : > { %1633 = vrcp.f32 %v1166_v42  ;;  %v1179_v47 = vmul.f32 1.442695, %v1178_v44 }
 0x93d   : > { %1635 = vpow2.f32 %v1179_v47 }
 0x945   : > { %v1634_v43 = vpop.eup %1633 }
 0x946   : > { %v1168_v45 = vmul.f32 1.0614054, %v1634_v43 }
 0x947   : > { %v1636_v55 = vpop.eup %1635 }
 0x948   : > { %v1169_v46 = vadd.f32 -1.4531521, %v1168_v45 }
 0x94a   : > { %v1170_v48 = vmul.f32 %v1634_v43, %v1169_v46 }
 0x94c   : > { %v1171_v49 = vadd.f32 1.4214138, %v1170_v48 }
 0x94e   : > { %v1172_v50 = vmul.f32 %v1634_v43, %v1171_v49 }
 0x950   : > { %v1173_v51 = vadd.f32 -0.28449672, %v1172_v50 }
 0x952   : > { %v1174_v52 = vmul.f32 %v1634_v43, %v1173_v51 }
 0x954   : > { %v1175_v53 = vadd.f32 0.2548296, %v1174_v52 }
 0x956   : > { %v1176_v54 = vmul.f32 %v1634_v43, %v1175_v53 }
 0x958   : > { %v1181_v56 = vmul.f32 %v1636_v55, %v1176_v54 }
 0x95a   : > { %v1182_v57 = vsub.f32 1.0, %v1181_v56 }
 0x95c   : > { %v1184_v58 = vsub.f32 0.0, %v1182_v57 }
 0x95e   : > { %v1185_v59 = vsel %vm1183_vm7, %v1182_v57, %v1184_v58 }
 0x95f   : > { %v1186_v61 = vadd.f32 1.0, %v1185_v59 }
 0x961   : > { %v1187_v62 = vmul.f32 %v1186_v61, %v1162_v60 }
 0x963   : > { %v1188_v63 = vpack.c.bf16 %v1187_v62, %v1187_v62 }
 0x965   : > { %1541 = vmatmul.mubr.bf16.vlgmr.msra.gmra.mrb[16].mxu1 %v1188_v63 }
 0xa38   : > { %v1294_v2 = vpop.f32.mrb[16].mxu1 }
 0xa39   : > { %v1295_v3 = vadd.f32 %v1405_v1, %v1294_v2  ;;  %v1542_v4 = vpop.f32.mrb[17].mxu1 }
 0xa3a   : > { %v1297_v6 = vpop.f32.mrb[18].mxu1 }
 0xa3b   : > { %v1300_v7 = vadd.f32 %v1295_v3, %v1951_v5  ;;  %v1543_v9 = vpop.f32.mrb[19].mxu1 }
 0xa3d   : > { %1301 = vst.msk [vmem:[%s431_s22] sm:$0xff] %vm440_vm0, %v1300_v7 }
 0xa3e   : > { %1650 = shalt.err (!%p1647_p3)
}
 0xa3f   : > { %s1651_s0 = scalar_lea.hbm %s2014_s1, 128  ;;  %s1655_s22 = scalar_lea.hbm %s2070_s13, 256 }
 0xa40   : > { %p1652_p4 = scmp.ne.s32.totalorder %s2014_s1, %s1651_s0  ;;  %p1656_p9 = scmp.lt.u32.totalorder %s2014_s1, %s2070_s13 }
 0xa41   : > { %p1657_p10 = scmp.lt.u32.totalorder %s1655_s22, %s1651_s0  ;;  %p1659_p12 = scmp.lt.u32.totalorder %s1651_s0, %s2014_s1 }
 0xa42   : > { %p1653_p7 = pnand %p1652_p4, %p1826_p5 }
 0xa43   : > { %p1658_p11 = por %p1657_p10, %p1656_p9 }
 0xa44   : > { %p1654_p8 = pneg %p1653_p7 }
 0xa45   : > { %p1660_p13 = por %p1659_p12, %p1658_p11 }
 0xa47   : > { %p1661_p0 = pnand %p1660_p13, %p1654_p8 }
 0xa49   : > { %1664 = shalt.err (!%p1661_p0)
}
 0xa4a   : > { %1544 = dma.vmem_to_hbm [thread:$0]  (%p1826_p5), %s2016_s23, 128, %s2014_s1, %s1303_s29  }
 0xa4b PF: > { %p1550_p1 = scmp.ge.s32.totalorder %s1699_s28, 2  ;;  %s1328_s2 = sand.u32 1, %s1687_s25  }
 0xa4c   : > { %s1329_s15 = scalar_lea.sflag [#allocation4], %s1328_s2 }
 0xa4d   : > { %p1547_p2 = pnand %p1550_p1, %p1830_p6 }
 0xa4f   : > { %1682 = dma.done.wait (!%p1547_p2), %s1329_s15, 128  }
 0xa50   : > { %1684 = vsyncadd (!%p1547_p2), %s1329_s15, 4294967168  ;;  %p23_p3 = scmp.ge.s32.totalorder %s1813_s14, 4   ;;  %s2079_s25 = smov %s1691_s26 }
 0xa51   : > { %s2080_s26 = smov %s1695_s27  ;;  %s2081_s27 = smov %s1824_s17 }
 0xa52   : > { %s2082_s28 = smov %s1813_s14  ;;  %25 = sbr.rel (!%p23_p3) target bundleno = 7 (0x7), region = 107 }
 0xa59   :  { %1334 = vsyncpa [#allocation4], 1 }
 0xa5a   :  { %1336 = vsyncpa [#allocation4 + $0x1], 1 }

</bundles_post_ra>
